<compile_context>
chip_gen: v7x
topology: tpu7x:2x2x1
jax: 0.10.0
libtpu: 0.0.40
codegen_flags: <defaults>
</compile_context>

<pallas_src>
import jax
import jax.numpy as jnp
from jax.experimental import pallas as pl
from jax.experimental.pallas import tpu as pltpu

_LANE = 128  # TPU lane width; hidden / W2-output dims are padded to this


def _round_up(x, m):
    return -(-x // m) * m


def _choose_batch_tile(B, max_tile):
    """Large tiles (few grid steps), but >=2 steps for big B (v7x megacore)."""
    if B <= 256:
        return B  # single block; block dim == array dim is always legal
    tb = _round_up(pl.cdiv(B, 2), 256)
    return max(256, min(tb, _round_up(max_tile, 256)))


def critic_kernel(x_ref, w1_ref, b1_ref, w2_ref, b2_ref, out_ref):
    # Layer 1: x @ W1 + b1, ReLU.  MXU matmul with f32 accumulation, VPU relu.
    h = jnp.dot(x_ref[...], w1_ref[...], preferred_element_type=jnp.float32)
    h = jnp.maximum(h + b1_ref[...], 0.0)                      # (TB, 128) f32
    # Layer 2: lane-dense (128, 128) matmul; keep only the real output lanes
    # for the store so HBM writeback is (TB, d_out) instead of (TB, 128).
    q = jnp.dot(h.astype(w2_ref.dtype), w2_ref[...],
                preferred_element_type=jnp.float32)            # (TB, 128) f32
    d_out = out_ref.shape[-1]
    out_ref[...] = (q[:, :d_out] + b2_ref[...]).astype(out_ref.dtype)


def prepare_params(w1, b1, w2, b2, mxu_dtype=jnp.float32):
    """One-time layout prep (hoisted out of the per-call hot path).

    w1: (D_in, H), b1: (1, H), w2: (H, D_out), b2: (1, D_out) — weights stored
    pre-transposed (in, out) so the kernel does plain x @ W.  Hidden dim and
    W2's output dim are zero-padded to 128 lanes (numerically exact: padded
    hidden cols are relu(0)=0 and padded output cols are never stored).
    """
    hidden = w1.shape[1]
    d_out = w2.shape[1]
    hp = _round_up(hidden, _LANE)
    op = _round_up(d_out, _LANE)
    w1p = jnp.pad(w1.astype(jnp.float32), ((0, 0), (0, hp - hidden))).astype(mxu_dtype)
    b1p = jnp.pad(b1.astype(jnp.float32), ((0, 0), (0, hp - hidden)))
    w2p = jnp.pad(w2.astype(jnp.float32),
                  ((0, hp - hidden), (0, op - d_out))).astype(mxu_dtype)
    b2p = b2.astype(jnp.float32)                    # unpadded (1, d_out)
    return w1p, b1p, w2p, b2p


def critic_forward(x, w1p, b1p, w2p, b2p, *, max_batch_tile=1024):
    """x: (B, D_in); params as returned by prepare_params. Returns (B, D_out) f32."""
    B, d_in = x.shape
    hp = w1p.shape[1]
    op = w2p.shape[1]
    d_out = b2p.shape[1]
    mxu_dtype = w1p.dtype
    xq = x.astype(mxu_dtype)                        # no-op for f32 params

    tb = _choose_batch_tile(B, max_batch_tile)
    grid = (pl.cdiv(B, tb),)

    itemsize = jnp.dtype(mxu_dtype).itemsize
    cost = pl.CostEstimate(
        flops=2 * B * hp * (d_in + op),
        transcendentals=0,
        bytes_accessed=(B * d_in * itemsize                 # x
                        + (d_in * hp + hp * op) * itemsize  # weights
                        + (hp + d_out) * 4                  # biases
                        + B * d_out * 4))                   # output

    return pl.pallas_call(
        critic_kernel,
        out_shape=jax.ShapeDtypeStruct((B, d_out), jnp.float32),
        grid=grid,
        in_specs=[
            pl.BlockSpec((tb, d_in), lambda i: (i, 0)),   # x: tiled over batch
            pl.BlockSpec((d_in, hp), lambda i: (0, 0)),   # w1: VMEM-resident
            pl.BlockSpec((1, hp), lambda i: (0, 0)),      # b1: VMEM-resident
            pl.BlockSpec((hp, op), lambda i: (0, 0)),     # w2: VMEM-resident
            pl.BlockSpec((1, d_out), lambda i: (0, 0)),   # b2: VMEM-resident
        ],
        out_specs=pl.BlockSpec((tb, d_out), lambda i: (i, 0)),
        compiler_params=pltpu.CompilerParams(
            dimension_semantics=("parallel",),   # batch shards across TCs (v7x)
        ),
        cost_estimate=cost,
    )(xq, w1p, b1p, w2p, b2p)


def critic_reference(x, w1, b1, w2, b2):
    """Plain-JAX reference at full f32 matmul precision."""
    hi = jax.lax.Precision.HIGHEST
    h = jnp.maximum(jnp.dot(x, w1, precision=hi) + b1, 0.0)
    return jnp.dot(h, w2, precision=hi) + b2


def init_params(key, d_in, hidden, d_out):
    """Mirror the PyTorch module: weights ~ N(0, 0.1); biases keep the default
    nn.Linear init U(-1/sqrt(fan_in), 1/sqrt(fan_in))."""
    k1, k2, k3, k4 = jax.random.split(key, 4)
    w1 = 0.1 * jax.random.normal(k1, (d_in, hidden), jnp.float32)   # (in, 100)
    b1 = jax.random.uniform(k2, (1, hidden), jnp.float32,
                            minval=-1.0 / jnp.sqrt(d_in),
                            maxval=1.0 / jnp.sqrt(d_in))
    w2 = 0.1 * jax.random.normal(k3, (hidden, d_out), jnp.float32)  # (100, out)
    b2 = jax.random.uniform(k4, (1, d_out), jnp.float32,
                            minval=-1.0 / jnp.sqrt(hidden),
                            maxval=1.0 / jnp.sqrt(hidden))
    return w1, b1, w2, b2


if __name__ == "__main__":
    key = jax.random.PRNGKey(0)
    kx, kp = jax.random.split(key)

    B, D_IN, HIDDEN, D_OUT = 8, 32, 100, 1   # state-dim 32, scalar Q value
    x = jax.random.normal(kx, (B, D_IN), jnp.float32)
    w1, b1, w2, b2 = init_params(kp, D_IN, HIDDEN, D_OUT)

    # One-time layout prep (hoisted out of the per-call hot path).
    params_f32 = prepare_params(w1, b1, w2, b2)
    forward = jax.jit(critic_forward)

    q = forward(x, *params_f32)
    jax.block_until_ready(q)
    q_ref = critic_reference(x, w1, b1, w2, b2)
    assert q.shape == (B, D_OUT)
    assert jnp.allclose(q, q_ref, atol=1e-5, rtol=1e-5)

    # Larger, non-tile-aligned batch: exercises the multi-step parallel grid
    # and the masked partial last block (no explicit x / output padding).
    B2 = 1000
    x2 = jax.random.normal(jax.random.PRNGKey(1), (B2, D_IN), jnp.float32)
    q2 = forward(x2, *params_f32)
    jax.block_until_ready(q2)
    q2_ref = critic_reference(x2, w1, b1, w2, b2)
    assert q2.shape == (B2, D_OUT)
    assert jnp.allclose(q2, q2_ref, atol=1e-5, rtol=1e-5)

    # bf16 MXU-operand path (halves x DMA bytes / weight VMEM); accumulation
    # stays f32, so the only error is bf16 input quantization (~1e-2 relative).
    params_bf16 = prepare_params(w1, b1, w2, b2, mxu_dtype=jnp.bfloat16)
    q3 = forward(x2, *params_bf16)
    jax.block_until_ready(q3)
    assert q3.shape == (B2, D_OUT)
    assert jnp.allclose(q3, q2_ref, atol=5e-2, rtol=5e-2)

    print("KERNEL_OK")
</pallas_src>

<mosaic_0001>
module attributes {stable_mosaic.version = 11 : i64} {
  func.func @critic_kernel(%arg0: i32, %arg1: memref<8x32xf32, #tpu.memory_space<vmem>>, %arg2: memref<32x128xf32, #tpu.memory_space<vmem>>, %arg3: memref<1x128xf32, #tpu.memory_space<vmem>>, %arg4: memref<128x128xf32, #tpu.memory_space<vmem>>, %arg5: memref<1x1xf32, #tpu.memory_space<vmem>>, %arg6: memref<8x1xf32, #tpu.memory_space<vmem>>) attributes {dimension_semantics = [#tpu.dimension_semantics<parallel>], iteration_bounds = array<i64: 1>, scalar_prefetch = 0 : i64, scratch_operands = 0 : i64, tpu.core_type = #tpu.core_type<tc>, window_params = [{transform_indices = @transform_0, window_bounds = array<i64: 8, 32>}, {pipeline_mode = #tpu.pipeline_mode<synchronous>, transform_indices = @transform_1, window_bounds = array<i64: 32, 128>}, {pipeline_mode = #tpu.pipeline_mode<synchronous>, transform_indices = @transform_2, window_bounds = array<i64: 1, 128>}, {pipeline_mode = #tpu.pipeline_mode<synchronous>, transform_indices = @transform_3, window_bounds = array<i64: 128, 128>}, {pipeline_mode = #tpu.pipeline_mode<synchronous>, transform_indices = @transform_4, window_bounds = array<i64: 1, 1>}, {transform_indices = @transform_5, window_bounds = array<i64: 8, 1>}]} {
    %c0 = arith.constant 0 : index
    %c0_0 = arith.constant 0 : index
    %0 = vector.load %arg1[%c0, %c0_0] : memref<8x32xf32, #tpu.memory_space<vmem>>, vector<8x32xf32>
    %c0_1 = arith.constant 0 : index
    %c0_2 = arith.constant 0 : index
    %1 = vector.load %arg2[%c0_1, %c0_2] : memref<32x128xf32, #tpu.memory_space<vmem>>, vector<32x128xf32>
    %cst = arith.constant dense<0.000000e+00> : vector<8x128xf32>
    %2 = tpu.matmul %0, %1, %cst {dimension_numbers = #tpu.dot_dimension_numbers<[1], [0], [0], [1], [0, 0, 1, 1], [], []>} : vector<8x32xf32>, vector<32x128xf32>, vector<8x128xf32> -> vector<8x128xf32>
    %c0_3 = arith.constant 0 : index
    %c0_4 = arith.constant 0 : index
    %3 = vector.load %arg3[%c0_3, %c0_4] : memref<1x128xf32, #tpu.memory_space<vmem>>, vector<1x128xf32>
    %4 = vector.broadcast %3 : vector<1x128xf32> to vector<8x128xf32>
    %5 = arith.addf %2, %4 : vector<8x128xf32>
    %cst_5 = arith.constant 0.000000e+00 : f32
    %6 = vector.broadcast %cst_5 : f32 to vector<8x128xf32>
    %7 = arith.maximumf %5, %6 : vector<8x128xf32>
    %c0_6 = arith.constant 0 : index
    %c0_7 = arith.constant 0 : index
    %8 = vector.load %arg4[%c0_6, %c0_7] : memref<128x128xf32, #tpu.memory_space<vmem>>, vector<128x128xf32>
    %cst_8 = arith.constant dense<0.000000e+00> : vector<8x128xf32>
    %9 = tpu.matmul %7, %8, %cst_8 {dimension_numbers = #tpu.dot_dimension_numbers<[1], [0], [0], [1], [0, 0, 1, 1], [], []>} : vector<8x128xf32>, vector<128x128xf32>, vector<8x128xf32> -> vector<8x128xf32>
    %10 = vector.extract_strided_slice %9 {offsets = [0, 0], sizes = [8, 1], strides = [1, 1]} : vector<8x128xf32> to vector<8x1xf32>
    %c0_9 = arith.constant 0 : index
    %c0_10 = arith.constant 0 : index
    %11 = vector.load %arg5[%c0_9, %c0_10] : memref<1x1xf32, #tpu.memory_space<vmem>>, vector<1x1xf32>
    %12 = vector.broadcast %11 : vector<1x1xf32> to vector<8x1xf32>
    %13 = arith.addf %10, %12 : vector<8x1xf32>
    %c0_11 = arith.constant 0 : index
    %c0_12 = arith.constant 0 : index
    %14 = vector.load %arg6[%c0_11, %c0_12] : memref<8x1xf32, #tpu.memory_space<vmem>>, vector<8x1xf32>
    tpu.vector_store %arg6[%c0_11, %c0_12], %13 {strides = array<i32>} : memref<8x1xf32, #tpu.memory_space<vmem>>, vector<8x1xf32>,
    return
  }
  func.func @transform_0(%arg0: i32) -> (i32, i32) {
    %c0_i32 = arith.constant 0 : i32
    %c0_i32_0 = arith.constant 0 : i32
    return %arg0, %c0_i32 : i32, i32
  }
  func.func @transform_1(%arg0: i32) -> (i32, i32) {
    %c0_i32 = arith.constant 0 : i32
    %c0_i32_0 = arith.constant 0 : i32
    %c0_i32_1 = arith.constant 0 : i32
    return %c0_i32, %c0_i32_0 : i32, i32
  }
  func.func @transform_2(%arg0: i32) -> (i32, i32) {
    %c0_i32 = arith.constant 0 : i32
    %c0_i32_0 = arith.constant 0 : i32
    %c0_i32_1 = arith.constant 0 : i32
    return %c0_i32, %c0_i32_0 : i32, i32
  }
  func.func @transform_3(%arg0: i32) -> (i32, i32) {
    %c0_i32 = arith.constant 0 : i32
    %c0_i32_0 = arith.constant 0 : i32
    %c0_i32_1 = arith.constant 0 : i32
    return %c0_i32, %c0_i32_0 : i32, i32
  }
  func.func @transform_4(%arg0: i32) -> (i32, i32) {
    %c0_i32 = arith.constant 0 : i32
    %c0_i32_0 = arith.constant 0 : i32
    %c0_i32_1 = arith.constant 0 : i32
    return %c0_i32, %c0_i32_0 : i32, i32
  }
  func.func @transform_5(%arg0: i32) -> (i32, i32) {
    %c0_i32 = arith.constant 0 : i32
    %c0_i32_0 = arith.constant 0 : i32
    return %arg0, %c0_i32 : i32, i32
  }
}

</mosaic_0001>

<bundles_post_ra>
// kernel: critic_forward.1
= control target key start
LH: loop header
LB: loop body
LE: loop exit
PB: predicated region body
PF: predicated region fallthrough
CT: control target
= control target key end

     0   :  { %s518_s0 = inlined_call_operand.hbm [shape: f32[8,32], index: 0, kind: input, shape index: {}]   ;;  %s519_s1 = inlined_call_operand.hbm [shape: f32[32,128], index: 1, kind: input, shape index: {}]   ;;  %s520_s2 = inlined_call_operand.vmem [shape: f32[1,128], index: 2, kind: input, shape index: {}]   ;;  %s521_s3 = inlined_call_operand.hbm [shape: f32[128,128], index: 3, kind: input, shape index: {}]   ;;  %s522_s4 = inlined_call_operand.<no memory space> [shape: f32[1,1], index: 4, kind: input, shape index: {}]   ;;  %s523_s5 = inlined_call_operand.vmem [shape: f32[8,1], index: 5, kind: output, shape index: {}]  }
   0x1   :  { %v10_v0 = vstv %s522_s4 }
   0x2   :  { %11 = vst [vmem:[#allocation2] sm:$0x1] %v10_v0 }
   0x3   :  { %12 = vsyncpa [#allocation4], 0 }
   0x4   :  { %13 = vsyncpa [#allocation6], 0  ;;  %s429_s20 = smov [#allocation5]   ;;  %s359_s24 = scalar_lea.hbm %s519_s1, 512 }
   0x5   :  { %s29_s21 = sshll.u32 %s429_s20, 4  ;;  %p360_p0 = scmp.ne.s32.totalorder %s519_s1, %s359_s24  ;;  %s30_s21 = int_to_ptr.vmem [resolvable:$true] %s29_s21 }
   0x6   :  { %p363_p1 = scmp.lt.u32.totalorder %s359_s24, %s519_s1 }
   0x8   :  { %p365_p2 = pnand %p363_p1, %p360_p0 }
   0xa   :  { %368 = shalt.err (!%p365_p2)
}
   0xb   :  { %s369_s4 = scalar_lea.vmem %s30_s21, 512  ;;  %p374_p4 = scmp.lt.s32.totalorder %s30_s21, %s30_s21 }
   0xc   :  { %p370_p3 = scmp.ne.s32.totalorder %s30_s21, %s369_s4  ;;  %p375_p5 = scmp.lt.s32.totalorder %s369_s4, %s369_s4 }
   0xe   :  { %p376_p6 = por %p375_p5, %p374_p4 }
  0x10   :  { %p377_p7 = pnand %p376_p6, %p370_p3 }
  0x12   :  { %380 = shalt.err (!%p377_p7)
}
  0x13   :  { %s430_s29 = smov 128   ;;  %s431_s30 = smov 8  }
  0x14   :  { %35 = dma.hbm_to_vmem [thread:$0]  %s519_s1, 512, %s30_s21, [#allocation6], %s430_s29, %s430_s29, %s431_s30  }
  0x15   :  { %s432_s8 = smov [#allocation3]   ;;  %s433_s10 = smov [#allocation7]  }
  0x16   :  { %s20_s9 = sshll.u32 %s432_s8, 4  ;;  %s43_s11 = sshll.u32 %s433_s10, 4  ;;  %s21_s9 = int_to_ptr.vmem [resolvable:$true] %s20_s9  ;;  %s44_s11 = int_to_ptr.vmem [resolvable:$true] %s43_s11 }
  0x17   :  { %s381_s14 = scalar_lea.hbm %s518_s0, 128 }
  0x18   :  { %p382_p8 = scmp.ne.s32.totalorder %s518_s0, %s381_s14  ;;  %p385_p9 = scmp.lt.u32.totalorder %s381_s14, %s518_s0 }
  0x1a   :  { %p387_p10 = pnand %p385_p9, %p382_p8 }
  0x1c   :  { %390 = shalt.err (!%p387_p10)
}
  0x1d   :  { %s391_s1 = scalar_lea.vmem %s21_s9, 128  ;;  %p396_p12 = scmp.lt.s32.totalorder %s21_s9, %s21_s9 }
  0x1e   :  { %p392_p11 = scmp.ne.s32.totalorder %s21_s9, %s391_s1  ;;  %p397_p13 = scmp.lt.s32.totalorder %s391_s1, %s391_s1 }
  0x20   :  { %p398_p0 = por %p397_p13, %p396_p12 }
  0x22   :  { %p399_p1 = pnand %p398_p0, %p392_p11 }
  0x24   :  { %402 = shalt.err (!%p399_p1)
}
  0x25   :  { %23 = dma.hbm_to_vmem [thread:$0]  %s518_s0, 128, %s21_s9, [#allocation4]  }
  0x26   :  { %s403_s23 = scalar_lea.hbm %s521_s3, 2048 }
  0x27   :  { %p404_p2 = scmp.ne.s32.totalorder %s521_s3, %s403_s23  ;;  %p407_p3 = scmp.lt.u32.totalorder %s403_s23, %s521_s3 }
  0x29   :  { %p409_p4 = pnand %p407_p3, %p404_p2 }
  0x2b   :  { %412 = shalt.err (!%p409_p4)
}
  0x2c   :  { %s413_s28 = scalar_lea.vmem %s44_s11, 2048  ;;  %p418_p6 = scmp.lt.s32.totalorder %s44_s11, %s44_s11 }
  0x2d   :  { %p414_p5 = scmp.ne.s32.totalorder %s44_s11, %s413_s28  ;;  %p419_p7 = scmp.lt.s32.totalorder %s413_s28, %s413_s28 }
  0x2f   :  { %p420_p8 = por %p419_p7, %p418_p6 }
  0x31   :  { %p421_p9 = pnand %p420_p8, %p414_p5 }
  0x33   :  { %424 = shalt.err (!%p421_p9)
}
  0x34   :  { %49 = dma.hbm_to_vmem [thread:$0]  %s521_s3, 2048, %s44_s11, [#allocation6], %s430_s29, %s430_s29, %s431_s30  }
  0x35   :  { %425 = dma.done.wait [#allocation4], 128  }
  0x36   :  { %426 = vsyncadd [#allocation4], 4294967168 }
  0x37   :  { %427 = dma.done.wait [#allocation6], 2560  }
  0x38   :  { %428 = vsyncadd [#allocation6], 4294964736  ;;  %v434_v1 = vmov 0.0|0.0   ;;  %vm435_vm0 = vmmov 0   ;;  %v436_v2 = vmov 0.0   ;;  %v62_v3 = vld [vmem:[#allocation5] sm:$0xff] }
  0x39   :  { %321 = vmatprep.subr.bf16.mxu0 %v434_v1  ;;  %283 = vmatprep.mubr.msk.f32.mxu0 %vm435_vm0, %v436_v2  ;;  %v63_v4 = vld [vmem:[#allocation5 + $0x8] sm:$0xff]  ;;  %v64_v5 = vld [vmem:[#allocation5 + $0x10] sm:$0xff]  ;;  %v65_v7 = vld [vmem:[#allocation5 + $0x18] sm:$0xff]  ;;  %vm73_vm1 = vcmask 261120   ;;  %vm242_vm2 = vcmask 7168  }
  0x3a   :  { %327 = vmatprep.subr.bf16.mxu1 %v434_v1  ;;  %318 = vmatprep.mubr.msk.f32.mxu1 %vm435_vm0, %v436_v2  ;;  %v322_v6 = vpack.c.bf16 %v63_v4, %v62_v3  ;;  %v148_v8 = vld [vmem:[#allocation7] sm:$0xff]  ;;  %v149_v9 = vld [vmem:[#allocation7 + $0x8] sm:$0xff]  ;;  %v150_v10 = vld [vmem:[#allocation7 + $0x10] sm:$0xff]  ;;  %v325_v12 = vpack.c.bf16 %v65_v7, %v64_v5 }
  0x3b   :  { %v151_v11 = vld [vmem:[#allocation7 + $0x18] sm:$0xff]  ;;  %v328_v13 = vpack.c.bf16 %v149_v9, %v148_v8  ;;  %v152_v15 = vld [vmem:[#allocation7 + $0x20] sm:$0xff]  ;;  %v153_v16 = vld [vmem:[#allocation7 + $0x28] sm:$0xff] }
  0x3c   :  { %323 = vmatpush3.bf16.msra.mxu0 %v322_v6  ;;  %v331_v14 = vpack.c.bf16 %v151_v11, %v150_v10  ;;  %v61_v17 = vld [vmem:[#allocation3] sm:$0xff]  ;;  %v334_v18 = vpack.c.bf16 %v153_v16, %v152_v15  ;;  %v154_v19 = vld [vmem:[#allocation7 + $0x30] sm:$0xff]  ;;  %v156_v22 = vld [vmem:[#allocation7 + $0x40] sm:$0xff] }
  0x3d   :  { %324 = vmatprep.subr.bf16.mxu0 %v434_v1  ;;  %329 = vmatpush3.bf16.msra.mxu1 %v328_v13  ;;  %v155_v20 = vld [vmem:[#allocation7 + $0x38] sm:$0xff]  ;;  %v157_v23 = vld [vmem:[#allocation7 + $0x48] sm:$0xff]  ;;  %v158_v25 = vld [vmem:[#allocation7 + $0x50] sm:$0xff] }
  0x3e   :  { %330 = vmatprep.subr.bf16.mxu1 %v434_v1  ;;  %v337_v21 = vpack.c.bf16 %v155_v20, %v154_v19  ;;  %v340_v24 = vpack.c.bf16 %v157_v23, %v156_v22  ;;  %v159_v26 = vld [vmem:[#allocation7 + $0x58] sm:$0xff]  ;;  %v160_v28 = vld [vmem:[#allocation7 + $0x60] sm:$0xff]  ;;  %v161_v29 = vld [vmem:[#allocation7 + $0x68] sm:$0xff] }
  0x3f   :  { %v343_v27 = vpack.c.bf16 %v159_v26, %v158_v25  ;;  %v346_v30 = vpack.c.bf16 %v161_v29, %v160_v28  ;;  %v162_v31 = vld [vmem:[#allocation7 + $0x70] sm:$0xff]  ;;  %v163_v32 = vld [vmem:[#allocation7 + $0x78] sm:$0xff] }
  0x40   :  { %326 = vmatpush3.bf16.msra.mxu0 %v325_v12  ;;  %v349_v33 = vpack.c.bf16 %v163_v32, %v162_v31  ;;  %v250_v34 = vld [vmem:[%s520_s2] ss:$0 sm:$0xff] }
  0x41   :  { %332 = vmatpush3.bf16.msra.mxu1 %v331_v14  ;;  %v252_v39 = vld [vmem:[#allocation2] ss:$0 sm:$0xff] }
  0x42   :  { %333 = vmatprep.subr.bf16.mxu1 %v434_v1 }
  0x43   :  { %284 = vmatmul.mubr.msk.f32.vlgmr.msra.gmra.mrb[0].mxu0 %vm73_vm1, %v61_v17 }
  0x45   :  { %335 = vmatpush3.bf16.msra.mxu1 %v334_v18 }
  0x46   :  { %336 = vmatprep.subr.bf16.mxu1 %v434_v1 }
  0x49   :  { %338 = vmatpush3.bf16.msra.mxu1 %v337_v21 }
  0x4a   :  { %339 = vmatprep.subr.bf16.mxu1 %v434_v1 }
  0x4d   :  { %341 = vmatpush3.bf16.msra.mxu1 %v340_v24 }
  0x4e   :  { %342 = vmatprep.subr.bf16.mxu1 %v434_v1 }
  0x51   :  { %344 = vmatpush3.bf16.msra.mxu1 %v343_v27 }
  0x52   :  { %345 = vmatprep.subr.bf16.mxu1 %v434_v1 }
  0x55   :  { %347 = vmatpush3.bf16.msra.mxu1 %v346_v30 }
  0x56   :  { %348 = vmatprep.subr.bf16.mxu1 %v434_v1 }
  0x59   :  { %350 = vmatpush3.bf16.msra.mxu1 %v349_v33 }
 0x116   :  { %v143_v35 = vpop.f32.mrb[0].mxu0 }
 0x117   :  { %v144_v36 = vadd.f32 %v250_v34, %v143_v35  ;;  %v285_v37 = vpop.f32.mrb[1].mxu0 }
 0x119   :  { %v147_v38 = vmax.f32 %v144_v36, 0.0 }
 0x11b   :  { %319 = vmatmul.mubr.f32.vlgmr.msra.gmra.mrb[0].mxu1 %v147_v38 }
 0x1ee   :  { %v230_v40 = vpop.f32.mrb[0].mxu1 }
 0x1ef   :  { %v241_v41 = vadd.f32 %v252_v39, %v230_v40  ;;  %v320_v42 = vpop.f32.mrb[1].mxu1 }
 0x1f1   :  { %243 = vst.msk [vmem:[%s523_s5] sm:$0xff] %vm242_vm2, %v241_v41 }
 0x1f2   :  { %248 = vsyncpa [#allocation4], 1 }
 0x1f3   :  { %249 = vsyncpa [#allocation6], 1 }

</bundles_post_ra>
